<compile_context>
chip_gen: v7x
topology: tpu7x:2x2x1
jax: 0.10.0
libtpu: 0.0.40
codegen_flags: <defaults>
</compile_context>

<pallas_src>
import functools

import jax
import jax.numpy as jnp
from jax.experimental import pallas as pl
from jax.experimental.pallas import tpu as pltpu

LANES = 128
ACC_SUBLANES = 8                      # f32 accumulator sublane count
MAX_BLOCK_BYTES = 4 * 1024 * 1024     # per-input, per-buffer block size cap
VMEM_LIMIT_BYTES = 32 * 1024 * 1024   # 2 inputs x 2 buffers x 4 MiB + headroom


def _round_up(x, m):
    return (x + m - 1) // m * m


def _mae_block_kernel(x_ref, y_ref, o_ref, *, block_rows, valid_rows, needs_mask):
    i = pl.program_id(0)

    @pl.when(i == 0)
    def _():
        o_ref[...] = jnp.zeros_like(o_ref)

    diff = jnp.abs(x_ref[...].astype(jnp.float32) - y_ref[...].astype(jnp.float32))

    def fold(d):
        # Fold the block into the resident (8, 128) accumulator with pure
        # vreg-aligned VPU adds (no per-step cross-lane XLU reduce).
        return jnp.sum(d.reshape(block_rows // ACC_SUBLANES, ACC_SUBLANES, LANES),
                       axis=0)

    if needs_mask:
        # Only the last block over-covers the valid rows; only it pays for the
        # iota + compare + select.
        is_last = i == pl.num_programs(0) - 1

        @pl.when(jnp.logical_not(is_last))
        def _():
            o_ref[...] += fold(diff)

        @pl.when(is_last)
        def _():
            row0 = i * block_rows
            row_idx = jax.lax.broadcasted_iota(jnp.int32, diff.shape, 0) + row0
            o_ref[...] += fold(jnp.where(row_idx < valid_rows, diff,
                                         jnp.float32(0.0)))
    else:
        o_ref[...] += fold(diff)


def mae_loss(inputs, targets):
    assert inputs.shape == targets.shape, "inputs/targets must have the same shape"
    n_elems = inputs.size
    if n_elems == 0:
        return jnp.float32(0.0)

    x_flat = inputs.reshape(-1)
    y_flat = targets.reshape(-1)

    valid_rows = n_elems // LANES
    bulk = valid_rows * LANES
    tail = n_elems - bulk

    total_sum = jnp.float32(0.0)

    if tail:
        # Fold the <128-element ragged tail with a tiny jnp.sum in the wrapper
        # instead of materializing padded copies of both full tensors.
        xt = x_flat[bulk:].astype(jnp.float32)
        yt = y_flat[bulk:].astype(jnp.float32)
        total_sum = total_sum + jnp.sum(jnp.abs(xt - yt))

    if valid_rows:
        if tail:
            # Ragged case: only the lane-aligned bulk prefix goes through the
            # kernel.
            x2 = x_flat[:bulk].reshape(valid_rows, LANES)
            y2 = y_flat[:bulk].reshape(valid_rows, LANES)
        else:
            # numel % 128 == 0: free contiguous reshape, zero extra HBM traffic.
            x2 = x_flat.reshape(valid_rows, LANES)
            y2 = y_flat.reshape(valid_rows, LANES)

        itemsizes = [jnp.dtype(a.dtype).itemsize for a in (x2, y2)]
        max_itemsize = max(itemsizes)
        # Dtype-specific sublane multiple: 8 (f32), 16 (bf16), 32 (int8/fp8).
        sublane_mult = max(ACC_SUBLANES, *(32 // s for s in itemsizes))

        max_block_rows = (MAX_BLOCK_BYTES // (LANES * max_itemsize)
                          ) // sublane_mult * sublane_mult
        max_block_rows = max(max_block_rows, sublane_mult)
        block_rows = min(max_block_rows, _round_up(valid_rows, sublane_mult))

        num_blocks = pl.cdiv(valid_rows, block_rows)
        needs_mask = (num_blocks * block_rows) != valid_rows

        kernel = functools.partial(
            _mae_block_kernel,
            block_rows=block_rows,
            valid_rows=valid_rows,
            needs_mask=needs_mask,
        )

        cost = pl.CostEstimate(
            flops=3 * bulk,
            transcendentals=0,
            bytes_accessed=sum(bulk * s for s in itemsizes)
                           + ACC_SUBLANES * LANES * 4,
        )

        partials = pl.pallas_call(
            kernel,
            out_shape=jax.ShapeDtypeStruct((ACC_SUBLANES, LANES), jnp.float32),
            grid_spec=pltpu.PrefetchScalarGridSpec(
                num_scalar_prefetch=0,
                grid=(num_blocks,),
                in_specs=[
                    pl.BlockSpec((block_rows, LANES), lambda i: (i, 0)),
                    pl.BlockSpec((block_rows, LANES), lambda i: (i, 0)),
                ],
                out_specs=pl.BlockSpec((ACC_SUBLANES, LANES), lambda i: (0, 0)),
            ),
            compiler_params=pltpu.CompilerParams(
                dimension_semantics=("arbitrary",),
                vmem_limit_bytes=VMEM_LIMIT_BYTES,
            ),
            cost_estimate=cost,
        )(x2, y2)

        # Single cross-lane reduce, done once outside the hot loop.
        total_sum = total_sum + jnp.sum(partials)

    return total_sum / n_elems


def mae_loss_ref(inputs, targets):
    return jnp.mean(jnp.abs(inputs.astype(jnp.float32) - targets.astype(jnp.float32)))


if __name__ == "__main__":
    key = jax.random.PRNGKey(0)
    k1, k2, k3, k4 = jax.random.split(key, 4)

    # NCHW, as the PyTorch module would receive; 2048 elems -> free-reshape path.
    shape = (2, 4, 16, 16)
    inputs = jax.random.normal(k1, shape, dtype=jnp.float32)
    targets = jax.random.normal(k2, shape, dtype=jnp.float32)

    loss = mae_loss(inputs, targets)
    jax.block_until_ready(loss)
    ref = mae_loss_ref(inputs, targets)
    assert jnp.allclose(loss, ref, rtol=1e-5, atol=1e-6), (loss, ref)

    # Ragged shape (385 elems): exercises the wrapper tail fold and the gated
    # last-block mask path.
    shape2 = (5, 77)
    a = jax.random.normal(k3, shape2, dtype=jnp.float32)
    b = jax.random.normal(k4, shape2, dtype=jnp.float32)
    loss2 = mae_loss(a, b)
    jax.block_until_ready(loss2)
    ref2 = mae_loss_ref(a, b)
    assert jnp.allclose(loss2, ref2, rtol=1e-5, atol=1e-6), (loss2, ref2)

    print("KERNEL_OK")
</pallas_src>

<mosaic_0001>
module attributes {stable_mosaic.version = 11 : i64} {
  func.func @_mae_block_kernel(%arg0: i32, %arg1: memref<16x128xf32, #tpu.memory_space<vmem>>, %arg2: memref<16x128xf32, #tpu.memory_space<vmem>>, %arg3: memref<8x128xf32, #tpu.memory_space<vmem>>) attributes {dimension_semantics = [#tpu.dimension_semantics<arbitrary>], iteration_bounds = array<i64: 1>, scalar_prefetch = 0 : i64, scratch_operands = 0 : i64, tpu.core_type = #tpu.core_type<tc>, window_params = [{transform_indices = @transform_0, window_bounds = array<i64: 16, 128>}, {transform_indices = @transform_1, window_bounds = array<i64: 16, 128>}, {pipeline_mode = #tpu.pipeline_mode<synchronous>, transform_indices = @transform_2, window_bounds = array<i64: 8, 128>}]} {
    %c0_i32 = arith.constant 0 : i32
    %0 = arith.cmpi eq, %arg0, %c0_i32 : i32
    %1 = arith.extui %0 : i1 to i32
    %c0_i32_0 = arith.constant 0 : i32
    %2 = arith.cmpi ne, %1, %c0_i32_0 : i32
    scf.if %2 {
      %cst_8 = arith.constant 0.000000e+00 : f32
      %12 = vector.broadcast %cst_8 : f32 to vector<8x128xf32>
      %c0_9 = arith.constant 0 : index
      %c0_10 = arith.constant 0 : index
      %13 = vector.load %arg3[%c0_9, %c0_10] : memref<8x128xf32, #tpu.memory_space<vmem>>, vector<8x128xf32>
      tpu.vector_store %arg3[%c0_9, %c0_10], %12 {strides = array<i32>} : memref<8x128xf32, #tpu.memory_space<vmem>>, vector<8x128xf32>,
    } else {
    }
    %c0 = arith.constant 0 : index
    %c0_1 = arith.constant 0 : index
    %3 = vector.load %arg1[%c0, %c0_1] : memref<16x128xf32, #tpu.memory_space<vmem>>, vector<16x128xf32>
    %c0_2 = arith.constant 0 : index
    %c0_3 = arith.constant 0 : index
    %4 = vector.load %arg2[%c0_2, %c0_3] : memref<16x128xf32, #tpu.memory_space<vmem>>, vector<16x128xf32>
    %5 = arith.subf %3, %4 : vector<16x128xf32>
    %6 = math.absf %5 : vector<16x128xf32>
    %c0_4 = arith.constant 0 : index
    %c0_5 = arith.constant 0 : index
    %7 = vector.load %arg3[%c0_4, %c0_5] : memref<8x128xf32, #tpu.memory_space<vmem>>, vector<8x128xf32>
    %8 = vector.shape_cast %6 : vector<16x128xf32> to vector<2x8x128xf32>
    %cst = arith.constant dense<0.000000e+00> : vector<8x128xf32>
    %9 = vector.multi_reduction <add>, %8, %cst [0] : vector<2x8x128xf32> to vector<8x128xf32>
    %10 = arith.addf %7, %9 : vector<8x128xf32>
    %c0_6 = arith.constant 0 : index
    %c0_7 = arith.constant 0 : index
    %11 = vector.load %arg3[%c0_6, %c0_7] : memref<8x128xf32, #tpu.memory_space<vmem>>, vector<8x128xf32>
    tpu.vector_store %arg3[%c0_6, %c0_7], %10 {strides = array<i32>} : memref<8x128xf32, #tpu.memory_space<vmem>>, vector<8x128xf32>,
    return
  }
  func.func @transform_0(%arg0: i32) -> (i32, i32) {
    %c0_i32 = arith.constant 0 : i32
    %c0_i32_0 = arith.constant 0 : i32
    return %arg0, %c0_i32 : i32, i32
  }
  func.func @transform_1(%arg0: i32) -> (i32, i32) {
    %c0_i32 = arith.constant 0 : i32
    %c0_i32_0 = arith.constant 0 : i32
    return %arg0, %c0_i32 : i32, i32
  }
  func.func @transform_2(%arg0: i32) -> (i32, i32) {
    %c0_i32 = arith.constant 0 : i32
    %c0_i32_0 = arith.constant 0 : i32
    %c0_i32_1 = arith.constant 0 : i32
    return %c0_i32, %c0_i32_0 : i32, i32
  }
}

</mosaic_0001>

<bundles_post_ra>
// kernel: tpu_custom_call.1
= control target key start
LH: loop header
LB: loop body
LE: loop exit
PB: predicated region body
PF: predicated region fallthrough
CT: control target
= control target key end

     0   :  { %7 = vsyncpa [#allocation3], 0  ;;  %s207_s0 = inlined_call_operand.hbm [shape: f32[16,128], index: 0, kind: input, shape index: {}]   ;;  %s208_s1 = inlined_call_operand.hbm [shape: f32[16,128], index: 1, kind: input, shape index: {}]   ;;  %s209_s2 = inlined_call_operand.hbm [shape: f32[8,128], index: 2, kind: output, shape index: {}]  }
   0x1   :  { %8 = vsyncpa [#allocation6], 0 }
   0x2   :  { %9 = vsyncpa [#allocation4], 0  ;;  %s151_s9 = smov [#allocation2]   ;;  %s79_s13 = scalar_lea.hbm %s207_s0, 256 }
   0x3   :  { %s15_s10 = sshll.u32 %s151_s9, 4  ;;  %p80_p0 = scmp.ne.s32.totalorder %s207_s0, %s79_s13  ;;  %s16_s10 = int_to_ptr.vmem [resolvable:$true] %s15_s10 }
   0x4   :  { %p83_p1 = scmp.lt.u32.totalorder %s79_s13, %s207_s0 }
   0x6   :  { %p85_p2 = pnand %p83_p1, %p80_p0 }
   0x8   :  { %88 = shalt.err (!%p85_p2)
}
   0x9   :  { %s89_s18 = scalar_lea.vmem %s16_s10, 256  ;;  %p94_p4 = scmp.lt.s32.totalorder %s16_s10, %s16_s10 }
   0xa   :  { %p90_p3 = scmp.ne.s32.totalorder %s16_s10, %s89_s18  ;;  %p95_p5 = scmp.lt.s32.totalorder %s89_s18, %s89_s18 }
   0xc   :  { %p96_p6 = por %p95_p5, %p94_p4 }
   0xe   :  { %p97_p7 = pnand %p96_p6, %p90_p3 }
  0x10   :  { %100 = shalt.err (!%p97_p7)
}
  0x11   :  { %s152_s19 = smov 128   ;;  %s153_s20 = smov 8  }
  0x12   :  { %21 = dma.hbm_to_vmem [thread:$0]  %s207_s0, 256, %s16_s10, [#allocation3], %s152_s19, %s152_s19, %s153_s20  }
  0x13   :  { %s154_s23 = smov [#allocation5]   ;;  %s101_s27 = scalar_lea.hbm %s208_s1, 256 }
  0x14   :  { %s27_s24 = sshll.u32 %s154_s23, 4  ;;  %p102_p8 = scmp.ne.s32.totalorder %s208_s1, %s101_s27  ;;  %s28_s24 = int_to_ptr.vmem [resolvable:$true] %s27_s24 }
  0x15   :  { %p105_p9 = scmp.lt.u32.totalorder %s101_s27, %s208_s1 }
  0x17   :  { %p107_p10 = pnand %p105_p9, %p102_p8 }
  0x19   :  { %110 = shalt.err (!%p107_p10)
}
  0x1a   :  { %s111_s4 = scalar_lea.vmem %s28_s24, 256  ;;  %p116_p12 = scmp.lt.s32.totalorder %s28_s24, %s28_s24 }
  0x1b   :  { %p112_p11 = scmp.ne.s32.totalorder %s28_s24, %s111_s4  ;;  %p117_p13 = scmp.lt.s32.totalorder %s111_s4, %s111_s4 }
  0x1d   :  { %p118_p0 = por %p117_p13, %p116_p12 }
  0x1f   :  { %p119_p1 = pnand %p118_p0, %p112_p11 }
  0x21   :  { %122 = shalt.err (!%p119_p1)
}
  0x22   :  { %33 = dma.hbm_to_vmem [thread:$0]  %s208_s1, 256, %s28_s24, [#allocation6], %s152_s19, %s152_s19, %s153_s20  }
  0x23   :  { %145 = dma.done.wait [#allocation3], 256  }
  0x24   :  { %146 = vsyncadd [#allocation3], 4294967040 }
  0x25   :  { %147 = dma.done.wait [#allocation6], 256  }
  0x26   :  { %148 = vsyncadd [#allocation6], 4294967040  ;;  %v45_v0 = vld [vmem:[#allocation2] sm:$0xff]  ;;  %v46_v1 = vld [vmem:[#allocation2 + $0x8] sm:$0xff]  ;;  %s155_s6 = smov [#allocation7]  }
  0x27   :  { %v47_v2 = vld [vmem:[#allocation5] sm:$0xff]  ;;  %v48_v3 = vld [vmem:[#allocation5 + $0x8] sm:$0xff]  ;;  %s63_s7 = sshll.u32 %s155_s6, 4  ;;  %s64_s7 = int_to_ptr.vmem [resolvable:$true] %s63_s7 }
  0x28   :  { %v49_v4 = vsub.f32 %v45_v0, %v47_v2  ;;  %v50_v5 = vsub.f32 %v46_v1, %v48_v3  ;;  %s123_s8 = scalar_lea.vmem %s64_s7, 128  ;;  %p128_p3 = scmp.lt.s32.totalorder %s64_s7, %s64_s7 }
  0x29   :  { %p124_p2 = scmp.ne.s32.totalorder %s64_s7, %s123_s8  ;;  %p129_p4 = scmp.lt.s32.totalorder %s123_s8, %s123_s8 }
  0x2a   :  { %v51_v6 = vand.u32 2147483647, %v49_v4  ;;  %v52_v7 = vand.u32 2147483647, %v50_v5 }
  0x2b   :  { %p130_p5 = por %p129_p4, %p128_p3 }
  0x2c   :  { %v54_v8 = vadd.f32 %v52_v7, %v51_v6 }
  0x2d   :  { %p131_p6 = pnand %p130_p5, %p124_p2 }
  0x2e   :  { %56 = vst [vmem:[#allocation7] sm:$0xff] %v54_v8 }
  0x2f   :  { %134 = shalt.err (!%p131_p6)
}
  0x30   :  { %s135_s10 = scalar_lea.hbm %s209_s2, 128 }
  0x31   :  { %p136_p7 = scmp.ne.s32.totalorder %s209_s2, %s135_s10  ;;  %p139_p8 = scmp.lt.u32.totalorder %s135_s10, %s209_s2 }
  0x33   :  { %p141_p9 = pnand %p139_p8, %p136_p7 }
  0x35   :  { %144 = shalt.err (!%p141_p9)
}
  0x36   :  { %66 = dma.vmem_to_hbm [thread:$0]  %s64_s7, 128, %s209_s2, [#allocation4]  }
  0x37   :  { %149 = dma.done.wait [#allocation4], 128  }
  0x38   :  { %150 = vsyncadd [#allocation4], 4294967168 }
  0x39   :  { %70 = vsyncpa [#allocation3], 1 }
  0x3a   :  { %71 = vsyncpa [#allocation6], 1 }
  0x3b   :  { %72 = vsyncpa [#allocation4], 1 }

</bundles_post_ra>
